<compile_context>
chip_gen: v7x
topology: tpu7x:2x2x1
jax: 0.10.0
libtpu: 0.0.40
codegen_flags: <defaults>
</compile_context>

<pallas_src>
import functools

import jax
import jax.numpy as jnp
from jax.experimental import pallas as pl
from jax.experimental.pallas import tpu as pltpu


def _round_up(x, m):
    return ((x + m - 1) // m) * m


def phen_predictor_kernel(x_ref, wc_ref, bc_ref, wl_ref, bl_ref, mask_ref, o_ref):
    """Fused: core encoder -> Linear -> Dropout(0.5) -> Sigmoid for one batch tile.

    x_ref    : VMEM (TB, Dp)  f32   input tile
    wc_ref   : VMEM (Dp, Hp)  bf16  core-model weight (pre-transposed, resident)
    bc_ref   : VMEM (1,  Hp)  f32   core-model bias (resident)
    wl_ref   : VMEM (Hp, Lp)  bf16  predictor Linear weight (pre-transposed, resident)
    bl_ref   : VMEM (1,  Lp)  f32   predictor Linear bias (resident)
    mask_ref : VMEM (TB, Lp)  f32   dropout mask, values in {0.0, 2.0}
    o_ref    : VMEM (TB, Lp)  f32   output probabilities tile
    """
    # --- synthetic core model: h = tanh(x @ Wc + bc) ------------------------
    x_bf = x_ref[...].astype(jnp.bfloat16)
    h = jnp.tanh(
        jnp.dot(x_bf, wc_ref[...], preferred_element_type=jnp.float32) + bc_ref[...]
    )

    # --- predictor linear: y = h @ Wl + bl ----------------------------------
    y = (
        jnp.dot(h.astype(jnp.bfloat16), wl_ref[...], preferred_element_type=jnp.float32)
        + bl_ref[...]
    )

    # --- dropout(p=0.5), training semantics: mask already holds {0, 1/(1-p)} ---
    y = y * mask_ref[...]

    # --- sigmoid (EUP logistic, not a VALU divide) --------------------------
    o_ref[...] = jax.nn.sigmoid(y)


def phen_predictor(x, wc, bc, wl, bl, dropout_key, *, train=True, tile_b=None):
    """Wrapper: pads to TPU-friendly shapes, builds the dropout mask, calls Pallas."""
    B, D = x.shape
    H = wc.shape[1]
    L = wl.shape[1]

    # Lane-dense padding of all feature dims to multiples of 128.
    D_p = _round_up(D, 128)
    H_p = _round_up(H, 128)
    L_p = _round_up(L, 128)

    # Batch tile: multiple of 8 sublanes; capped so the double-buffered
    # x/mask/out tiles plus resident bf16 weights stay far under the 32 MiB
    # scoped-VMEM default (and v7x's 64 MiB physical VMEM).
    if tile_b is None:
        tile_b = 256 if B >= 256 else _round_up(B, 8)
    B_p = _round_up(B, tile_b)

    f32 = jnp.float32
    xp = jnp.zeros((B_p, D_p), f32).at[:B, :D].set(x.astype(f32))
    wcp = jnp.zeros((D_p, H_p), jnp.bfloat16).at[:D, :H].set(wc.astype(jnp.bfloat16))
    bcp = jnp.zeros((1, H_p), f32).at[:, :H].set(bc.astype(f32))
    wlp = jnp.zeros((H_p, L_p), jnp.bfloat16).at[:H, :L].set(wl.astype(jnp.bfloat16))
    blp = jnp.zeros((1, L_p), f32).at[:, :L].set(bl.astype(f32))

    # Dropout mask with the 1/(1-p) scale folded in: {0.0, 2.0}.
    if train:
        keep = jax.random.bernoulli(dropout_key, 0.5, (B_p, L_p))
        mask = jnp.where(keep, f32(2.0), f32(0.0))
    else:
        mask = jnp.ones((B_p, L_p), f32)

    grid = (B_p // tile_b,)

    out_padded = pl.pallas_call(
        phen_predictor_kernel,
        out_shape=jax.ShapeDtypeStruct((B_p, L_p), f32),
        grid_spec=pltpu.PrefetchScalarGridSpec(
            num_scalar_prefetch=0,
            grid=grid,
            in_specs=[
                pl.BlockSpec((tile_b, D_p), lambda i: (i, 0)),  # x tile
                pl.BlockSpec((D_p, H_p), lambda i: (0, 0)),     # Wc (resident)
                pl.BlockSpec((1, H_p), lambda i: (0, 0)),       # bc (resident)
                pl.BlockSpec((H_p, L_p), lambda i: (0, 0)),     # Wl (resident)
                pl.BlockSpec((1, L_p), lambda i: (0, 0)),       # bl (resident)
                pl.BlockSpec((tile_b, L_p), lambda i: (i, 0)),  # dropout mask tile
            ],
            out_specs=pl.BlockSpec((tile_b, L_p), lambda i: (i, 0)),
        ),
        compiler_params=pltpu.CompilerParams(
            dimension_semantics=("parallel",),
        ),
    )(xp, wcp, bcp, wlp, blp, mask)

    return out_padded[:B, :L]


if __name__ == "__main__":
    # Small shapes consistent with the module: batch=8, input_dim=32,
    # hidden_size (core_model.output_dim)=32, label_dim=8.
    B, D_IN, H, L = 8, 32, 32, 8

    key = jax.random.PRNGKey(0)
    kx, kwc, kbc, kwl, kbl, kdrop = jax.random.split(key, 6)

    x = jax.random.normal(kx, (B, D_IN), dtype=jnp.float32)

    # Weights stored pre-transposed ([in_features, out_features]) so the kernel
    # computes x @ W directly.
    wc = jax.random.normal(kwc, (D_IN, H), dtype=jnp.float32) * 0.1
    bc = jax.random.normal(kbc, (1, H), dtype=jnp.float32) * 0.1
    wl = jax.random.normal(kwl, (H, L), dtype=jnp.float32) * 0.1
    bl = jax.random.normal(kbl, (1, L), dtype=jnp.float32) * 0.1

    out = phen_predictor(x, wc, bc, wl, bl, kdrop, train=True)
    out = jax.block_until_ready(out)

    assert out.shape == (B, L)
    assert bool(jnp.all((out >= 0.0) & (out <= 1.0)))  # sigmoid range

    print("KERNEL_OK")
</pallas_src>

<mosaic_0001>
module attributes {stable_mosaic.version = 11 : i64} {
  func.func @phen_predictor_kernel(%arg0: i32, %arg1: memref<8x128xf32, #tpu.memory_space<vmem>>, %arg2: memref<128x128xbf16, #tpu.memory_space<vmem>>, %arg3: memref<1x128xf32, #tpu.memory_space<vmem>>, %arg4: memref<128x128xbf16, #tpu.memory_space<vmem>>, %arg5: memref<1x128xf32, #tpu.memory_space<vmem>>, %arg6: memref<8x128xf32, #tpu.memory_space<vmem>>, %arg7: memref<8x128xf32, #tpu.memory_space<vmem>>) attributes {dimension_semantics = [#tpu.dimension_semantics<parallel>], iteration_bounds = array<i64: 1>, scalar_prefetch = 0 : i64, scratch_operands = 0 : i64, tpu.core_type = #tpu.core_type<tc>, window_params = [{transform_indices = @transform_0, window_bounds = array<i64: 8, 128>}, {pipeline_mode = #tpu.pipeline_mode<synchronous>, transform_indices = @transform_1, window_bounds = array<i64: 128, 128>}, {pipeline_mode = #tpu.pipeline_mode<synchronous>, transform_indices = @transform_2, window_bounds = array<i64: 1, 128>}, {pipeline_mode = #tpu.pipeline_mode<synchronous>, transform_indices = @transform_3, window_bounds = array<i64: 128, 128>}, {pipeline_mode = #tpu.pipeline_mode<synchronous>, transform_indices = @transform_4, window_bounds = array<i64: 1, 128>}, {transform_indices = @transform_5, window_bounds = array<i64: 8, 128>}, {transform_indices = @transform_6, window_bounds = array<i64: 8, 128>}]} {
    %c0 = arith.constant 0 : index
    %c0_0 = arith.constant 0 : index
    %0 = vector.load %arg1[%c0, %c0_0] : memref<8x128xf32, #tpu.memory_space<vmem>>, vector<8x128xf32>
    %1 = arith.truncf %0 : vector<8x128xf32> to vector<8x128xbf16>
    %c0_1 = arith.constant 0 : index
    %c0_2 = arith.constant 0 : index
    %2 = vector.load %arg2[%c0_1, %c0_2] : memref<128x128xbf16, #tpu.memory_space<vmem>>, vector<128x128xbf16>
    %cst = arith.constant dense<0.000000e+00> : vector<8x128xf32>
    %3 = tpu.matmul %1, %2, %cst {dimension_numbers = #tpu.dot_dimension_numbers<[1], [0], [0], [1], [0, 0, 1, 1], [], []>} : vector<8x128xbf16>, vector<128x128xbf16>, vector<8x128xf32> -> vector<8x128xf32>
    %c0_3 = arith.constant 0 : index
    %c0_4 = arith.constant 0 : index
    %4 = vector.load %arg3[%c0_3, %c0_4] : memref<1x128xf32, #tpu.memory_space<vmem>>, vector<1x128xf32>
    %5 = vector.broadcast %4 : vector<1x128xf32> to vector<8x128xf32>
    %6 = arith.addf %3, %5 : vector<8x128xf32>
    %7 = math.tanh %6 : vector<8x128xf32>
    %8 = arith.truncf %7 : vector<8x128xf32> to vector<8x128xbf16>
    %c0_5 = arith.constant 0 : index
    %c0_6 = arith.constant 0 : index
    %9 = vector.load %arg4[%c0_5, %c0_6] : memref<128x128xbf16, #tpu.memory_space<vmem>>, vector<128x128xbf16>
    %cst_7 = arith.constant dense<0.000000e+00> : vector<8x128xf32>
    %10 = tpu.matmul %8, %9, %cst_7 {dimension_numbers = #tpu.dot_dimension_numbers<[1], [0], [0], [1], [0, 0, 1, 1], [], []>} : vector<8x128xbf16>, vector<128x128xbf16>, vector<8x128xf32> -> vector<8x128xf32>
    %c0_8 = arith.constant 0 : index
    %c0_9 = arith.constant 0 : index
    %11 = vector.load %arg5[%c0_8, %c0_9] : memref<1x128xf32, #tpu.memory_space<vmem>>, vector<1x128xf32>
    %12 = vector.broadcast %11 : vector<1x128xf32> to vector<8x128xf32>
    %13 = arith.addf %10, %12 : vector<8x128xf32>
    %c0_10 = arith.constant 0 : index
    %c0_11 = arith.constant 0 : index
    %14 = vector.load %arg6[%c0_10, %c0_11] : memref<8x128xf32, #tpu.memory_space<vmem>>, vector<8x128xf32>
    %15 = arith.mulf %13, %14 : vector<8x128xf32>
    %16 = arith.negf %15 : vector<8x128xf32>
    %17 = math.exp %16 : vector<8x128xf32>
    %cst_12 = arith.constant 1.000000e+00 : f32
    %18 = vector.broadcast %cst_12 : f32 to vector<8x128xf32>
    %19 = arith.addf %18, %17 : vector<8x128xf32>
    %20 = arith.divf %18, %19 : vector<8x128xf32>
    %c0_13 = arith.constant 0 : index
    %c0_14 = arith.constant 0 : index
    %21 = vector.load %arg7[%c0_13, %c0_14] : memref<8x128xf32, #tpu.memory_space<vmem>>, vector<8x128xf32>
    tpu.vector_store %arg7[%c0_13, %c0_14], %20 {strides = array<i32>} : memref<8x128xf32, #tpu.memory_space<vmem>>, vector<8x128xf32>,
    return
  }
  func.func @transform_0(%arg0: i32) -> (i32, i32) {
    %c0_i32 = arith.constant 0 : i32
    %c0_i32_0 = arith.constant 0 : i32
    return %arg0, %c0_i32 : i32, i32
  }
  func.func @transform_1(%arg0: i32) -> (i32, i32) {
    %c0_i32 = arith.constant 0 : i32
    %c0_i32_0 = arith.constant 0 : i32
    %c0_i32_1 = arith.constant 0 : i32
    return %c0_i32, %c0_i32_0 : i32, i32
  }
  func.func @transform_2(%arg0: i32) -> (i32, i32) {
    %c0_i32 = arith.constant 0 : i32
    %c0_i32_0 = arith.constant 0 : i32
    %c0_i32_1 = arith.constant 0 : i32
    return %c0_i32, %c0_i32_0 : i32, i32
  }
  func.func @transform_3(%arg0: i32) -> (i32, i32) {
    %c0_i32 = arith.constant 0 : i32
    %c0_i32_0 = arith.constant 0 : i32
    %c0_i32_1 = arith.constant 0 : i32
    return %c0_i32, %c0_i32_0 : i32, i32
  }
  func.func @transform_4(%arg0: i32) -> (i32, i32) {
    %c0_i32 = arith.constant 0 : i32
    %c0_i32_0 = arith.constant 0 : i32
    %c0_i32_1 = arith.constant 0 : i32
    return %c0_i32, %c0_i32_0 : i32, i32
  }
  func.func @transform_5(%arg0: i32) -> (i32, i32) {
    %c0_i32 = arith.constant 0 : i32
    %c0_i32_0 = arith.constant 0 : i32
    return %arg0, %c0_i32 : i32, i32
  }
  func.func @transform_6(%arg0: i32) -> (i32, i32) {
    %c0_i32 = arith.constant 0 : i32
    %c0_i32_0 = arith.constant 0 : i32
    return %arg0, %c0_i32 : i32, i32
  }
}

</mosaic_0001>

<bundles_post_ra>
// kernel: tpu_custom_call.1
= control target key start
LH: loop header
LB: loop body
LE: loop exit
PB: predicated region body
PF: predicated region fallthrough
CT: control target
= control target key end

     0   :  { %11 = vsyncpa [#allocation3], 0  ;;  %s622_s0 = inlined_call_operand.hbm [shape: f32[8,128], index: 0, kind: input, shape index: {}]   ;;  %s623_s1 = inlined_call_operand.hbm [shape: bf16[128,128], index: 1, kind: input, shape index: {}]   ;;  %s624_s2 = inlined_call_operand.vmem [shape: f32[1,128], index: 2, kind: input, shape index: {}]   ;;  %s625_s3 = inlined_call_operand.hbm [shape: bf16[128,128], index: 3, kind: input, shape index: {}]   ;;  %s626_s4 = inlined_call_operand.vmem [shape: f32[1,128], index: 4, kind: input, shape index: {}]   ;;  %s627_s5 = inlined_call_operand.vmem [shape: f32[8,128], index: 5, kind: input, shape index: {}]   ;;  %s628_s6 = inlined_call_operand.hbm [shape: f32[8,128], index: 6, kind: output, shape index: {}]  }
   0x1   :  { %12 = vsyncpa [#allocation6], 0 }
   0x2   :  { %13 = vsyncpa [#allocation4], 0  ;;  %s516_s21 = smov [#allocation5]   ;;  %s422_s25 = scalar_lea.hbm %s623_s1, 1024 }
   0x3   :  { %s29_s22 = sshll.u32 %s516_s21, 4  ;;  %p423_p0 = scmp.ne.s32.totalorder %s623_s1, %s422_s25  ;;  %s30_s22 = int_to_ptr.vmem [resolvable:$true] %s29_s22 }
   0x4   :  { %p426_p1 = scmp.lt.u32.totalorder %s422_s25, %s623_s1 }
   0x6   :  { %p428_p2 = pnand %p426_p1, %p423_p0 }
   0x8   :  { %431 = shalt.err (!%p428_p2)
}
   0x9   :  { %s432_s30 = scalar_lea.vmem %s30_s22, 1024  ;;  %p437_p4 = scmp.lt.s32.totalorder %s30_s22, %s30_s22 }
   0xa   :  { %p433_p3 = scmp.ne.s32.totalorder %s30_s22, %s432_s30  ;;  %p438_p5 = scmp.lt.s32.totalorder %s432_s30, %s432_s30 }
   0xc   :  { %p439_p6 = por %p438_p5, %p437_p4 }
   0xe   :  { %p440_p7 = pnand %p439_p6, %p433_p3 }
  0x10   :  { %443 = shalt.err (!%p440_p7)
}
  0x11   :  { %s517_s7 = smov 64   ;;  %s518_s8 = smov 4  }
  0x12   :  { %35 = dma.hbm_to_vmem [thread:$0]  %s623_s1, 1024, %s30_s22, [#allocation6], %s517_s7, %s517_s7, %s518_s8  }
  0x13   :  { %s519_s11 = smov [#allocation2]   ;;  %s520_s13 = smov [#allocation7]  }
  0x14   :  { %s20_s12 = sshll.u32 %s519_s11, 4  ;;  %s43_s14 = sshll.u32 %s520_s13, 4  ;;  %s21_s12 = int_to_ptr.vmem [resolvable:$true] %s20_s12  ;;  %s44_s14 = int_to_ptr.vmem [resolvable:$true] %s43_s14 }
  0x15   :  { %s444_s17 = scalar_lea.hbm %s622_s0, 128 }
  0x16   :  { %p445_p8 = scmp.ne.s32.totalorder %s622_s0, %s444_s17  ;;  %p448_p9 = scmp.lt.u32.totalorder %s444_s17, %s622_s0 }
  0x18   :  { %p450_p10 = pnand %p448_p9, %p445_p8 }
  0x1a   :  { %453 = shalt.err (!%p450_p10)
}
  0x1b   :  { %s454_s1 = scalar_lea.vmem %s21_s12, 128  ;;  %p459_p12 = scmp.lt.s32.totalorder %s21_s12, %s21_s12 }
  0x1c   :  { %p455_p11 = scmp.ne.s32.totalorder %s21_s12, %s454_s1  ;;  %p460_p13 = scmp.lt.s32.totalorder %s454_s1, %s454_s1 }
  0x1e   :  { %p461_p0 = por %p460_p13, %p459_p12 }
  0x20   :  { %p462_p1 = pnand %p461_p0, %p455_p11 }
  0x22   :  { %465 = shalt.err (!%p462_p1)
}
  0x23   :  { %23 = dma.hbm_to_vmem [thread:$0]  %s622_s0, 128, %s21_s12, [#allocation3]  }
  0x24   :  { %s466_s26 = scalar_lea.hbm %s625_s3, 1024 }
  0x25   :  { %p467_p2 = scmp.ne.s32.totalorder %s625_s3, %s466_s26  ;;  %p470_p3 = scmp.lt.u32.totalorder %s466_s26, %s625_s3 }
  0x27   :  { %p472_p4 = pnand %p470_p3, %p467_p2 }
  0x29   :  { %475 = shalt.err (!%p472_p4)
}
  0x2a   :  { %s476_s9 = scalar_lea.vmem %s44_s14, 1024  ;;  %p481_p6 = scmp.lt.s32.totalorder %s44_s14, %s44_s14 }
  0x2b   :  { %p477_p5 = scmp.ne.s32.totalorder %s44_s14, %s476_s9  ;;  %p482_p7 = scmp.lt.s32.totalorder %s476_s9, %s476_s9 }
  0x2d   :  { %p483_p8 = por %p482_p7, %p481_p6 }
  0x2f   :  { %p484_p9 = pnand %p483_p8, %p477_p5 }
  0x31   :  { %487 = shalt.err (!%p484_p9)
}
  0x32   :  { %49 = dma.hbm_to_vmem [thread:$0]  %s625_s3, 1024, %s44_s14, [#allocation6], %s517_s7, %s517_s7, %s518_s8  }
  0x33   :  { %510 = dma.done.wait [#allocation3], 128  }
  0x34   :  { %511 = vsyncadd [#allocation3], 4294967168 }
  0x35   :  { %512 = dma.done.wait [#allocation6], 2048  }
  0x36   :  { %513 = vsyncadd [#allocation6], 4294965248  ;;  %v521_v0 = vmov 0.0   ;;  %vm522_vm0 = vmmov 0   ;;  %v400_v1 = vld [vmem:[#allocation5] sm:$0xff]   ;;  %v401_v2 = vld [vmem:[#allocation5 + $0x8] sm:$0xff]  }
  0x37   :  { %352 = vmatprep.subr.bf16.mxu0 %v521_v0  ;;  %368 = vmatprep.mubr.msk.bf16.mxu0 %vm522_vm0, %v521_v0  ;;  %v402_v3 = vld [vmem:[#allocation5 + $0x10] sm:$0xff]   ;;  %v408_v4 = vld [vmem:[#allocation7] sm:$0xff]   ;;  %v403_v5 = vld [vmem:[#allocation5 + $0x18] sm:$0xff]  }
  0x38   :  { %372 = vmatprep.subr.bf16.mxu1 %v521_v0  ;;  %388 = vmatprep.mubr.msk.bf16.mxu1 %vm522_vm0, %v521_v0  ;;  %v409_v6 = vld [vmem:[#allocation7 + $0x8] sm:$0xff]   ;;  %v404_v7 = vld [vmem:[#allocation5 + $0x20] sm:$0xff]   ;;  %v410_v8 = vld [vmem:[#allocation7 + $0x10] sm:$0xff]  }
  0x39   :  { %353 = vmatpush3.bf16.msra.mxu0 %v400_v1  ;;  %373 = vmatpush3.bf16.msra.mxu1 %v408_v4  ;;  %v405_v9 = vld [vmem:[#allocation5 + $0x28] sm:$0xff]   ;;  %v411_v10 = vld [vmem:[#allocation7 + $0x18] sm:$0xff]   ;;  %v406_v11 = vld [vmem:[#allocation5 + $0x30] sm:$0xff]  }
  0x3a   :  { %354 = vmatprep.subr.bf16.mxu0 %v521_v0  ;;  %374 = vmatprep.subr.bf16.mxu1 %v521_v0  ;;  %v407_v12 = vld [vmem:[#allocation5 + $0x38] sm:$0xff]   ;;  %v412_v15 = vld [vmem:[#allocation7 + $0x20] sm:$0xff]   ;;  %v413_v16 = vld [vmem:[#allocation7 + $0x28] sm:$0xff]  }
  0x3b   :  { %v64_v13 = vld [vmem:[#allocation2] sm:$0xff]  ;;  %v414_v17 = vld [vmem:[#allocation7 + $0x30] sm:$0xff]  }
  0x3c   :  { %v65_v14 = vpack.c.bf16 %v64_v13, %v64_v13  ;;  %v415_v18 = vld [vmem:[#allocation7 + $0x38] sm:$0xff]  }
  0x3d   :  { %355 = vmatpush3.bf16.msra.mxu0 %v401_v2  ;;  %375 = vmatpush3.bf16.msra.mxu1 %v409_v6  ;;  %v315_v19 = vld [vmem:[%s624_s2] ss:$0 sm:$0xff]  ;;  %s523_s2 = smov [#allocation8]  }
  0x3e   :  { %356 = vmatprep.subr.bf16.mxu0 %v521_v0  ;;  %376 = vmatprep.subr.bf16.mxu1 %v521_v0  ;;  %v324_v27 = vld [vmem:[%s626_s4] ss:$0 sm:$0xff]  ;;  %s305_s14 = sshll.u32 %s523_s2, 4  ;;  %s306_s14 = int_to_ptr.vmem [resolvable:$true] %s305_s14 }
  0x3f   :  { %v290_v29 = vld [vmem:[%s627_s5] sm:$0xff]  ;;  %s488_s4 = scalar_lea.vmem %s306_s14, 128  ;;  %p493_p11 = scmp.lt.s32.totalorder %s306_s14, %s306_s14 }
  0x40   :  { %p489_p10 = scmp.ne.s32.totalorder %s306_s14, %s488_s4  ;;  %p494_p12 = scmp.lt.s32.totalorder %s488_s4, %s488_s4 }
  0x41   :  { %357 = vmatpush3.bf16.msra.mxu0 %v402_v3  ;;  %377 = vmatpush3.bf16.msra.mxu1 %v410_v8 }
  0x42   :  { %358 = vmatprep.subr.bf16.mxu0 %v521_v0  ;;  %378 = vmatprep.subr.bf16.mxu1 %v521_v0  ;;  %p495_p13 = por %p494_p12, %p493_p11 }
  0x44   :  { %p496_p0 = pnand %p495_p13, %p489_p10 }
  0x45   :  { %359 = vmatpush3.bf16.msra.mxu0 %v403_v5  ;;  %379 = vmatpush3.bf16.msra.mxu1 %v411_v10 }
  0x46   :  { %360 = vmatprep.subr.bf16.mxu0 %v521_v0  ;;  %380 = vmatprep.subr.bf16.mxu1 %v521_v0 }
  0x49   :  { %361 = vmatpush3.bf16.msra.mxu0 %v404_v7  ;;  %381 = vmatpush3.bf16.msra.mxu1 %v412_v15 }
  0x4a   :  { %362 = vmatprep.subr.bf16.mxu0 %v521_v0  ;;  %382 = vmatprep.subr.bf16.mxu1 %v521_v0 }
  0x4d   :  { %363 = vmatpush3.bf16.msra.mxu0 %v405_v9  ;;  %383 = vmatpush3.bf16.msra.mxu1 %v413_v16 }
  0x4e   :  { %364 = vmatprep.subr.bf16.mxu0 %v521_v0  ;;  %384 = vmatprep.subr.bf16.mxu1 %v521_v0 }
  0x51   :  { %365 = vmatpush3.bf16.msra.mxu0 %v406_v11  ;;  %385 = vmatpush3.bf16.msra.mxu1 %v414_v17 }
  0x52   :  { %366 = vmatprep.subr.bf16.mxu0 %v521_v0  ;;  %386 = vmatprep.subr.bf16.mxu1 %v521_v0 }
  0x55   :  { %367 = vmatpush3.bf16.msra.mxu0 %v407_v12  ;;  %387 = vmatpush3.bf16.msra.mxu1 %v415_v18 }
  0x58   :  { %369 = vmatmul.mubr.bf16.vlgmr.msra.gmra.mrb[0].mxu0 %v65_v14 }
 0x12b   :  { %v171_v20 = vpop.f32.mrb[0].mxu0 }
 0x12c   :  { %v172_v21 = vadd.f32 %v315_v19, %v171_v20  ;;  %v370_v22 = vpop.f32.mrb[1].mxu0 }
 0x12d   :  { %v174_v23 = vpop.f32.mrb[2].mxu0 }
 0x12e   :  { %416 = vtanh.f32 %v172_v21  ;;  %v371_v24 = vpop.f32.mrb[3].mxu0 }
 0x138   :  { %v417_v25 = vpop.eup %416 }
 0x139   :  { %v178_v26 = vpack.c.bf16 %v417_v25, %v417_v25 }
 0x13b   :  { %389 = vmatmul.mubr.bf16.vlgmr.msra.gmra.mrb[0].mxu1 %v178_v26 }
 0x20e   :  { %v284_v28 = vpop.f32.mrb[0].mxu1 }
 0x20f   :  { %v285_v30 = vadd.f32 %v324_v27, %v284_v28  ;;  %v390_v31 = vpop.f32.mrb[1].mxu1 }
 0x210   :  { %v287_v32 = vpop.f32.mrb[2].mxu1 }
 0x211   :  { %v291_v33 = vmul.f32 %v290_v29, %v285_v30  ;;  %v391_v34 = vpop.f32.mrb[3].mxu1 }
 0x213   :  { %v333_v35 = vmul.f32 -1.442695, %v291_v33 }
 0x215   :  { %418 = vpow2.f32 %v333_v35 }
 0x21f   :  { %v419_v36 = vpop.eup %418 }
 0x220   :  { %v295_v37 = vadd.f32 1.0, %v419_v36 }
 0x222   :  { %420 = vrcp.f32 %v295_v37 }
 0x22c   :  { %v421_v38 = vpop.eup %420 }
 0x22d   :  { %298 = vst [vmem:[#allocation8] sm:$0xff] %v421_v38 }
 0x22e   :  { %499 = shalt.err (!%p496_p0)
}
 0x22f   :  { %s500_s16 = scalar_lea.hbm %s628_s6, 128 }
 0x230   :  { %p501_p1 = scmp.ne.s32.totalorder %s628_s6, %s500_s16  ;;  %p504_p2 = scmp.lt.u32.totalorder %s500_s16, %s628_s6 }
 0x232   :  { %p506_p3 = pnand %p504_p2, %p501_p1 }
 0x234   :  { %509 = shalt.err (!%p506_p3)
}
 0x235   :  { %308 = dma.vmem_to_hbm [thread:$0]  %s306_s14, 128, %s628_s6, [#allocation4]  }
 0x236   :  { %514 = dma.done.wait [#allocation4], 128  }
 0x237   :  { %515 = vsyncadd [#allocation4], 4294967168 }
 0x238   :  { %312 = vsyncpa [#allocation3], 1 }
 0x239   :  { %313 = vsyncpa [#allocation6], 1 }
 0x23a   :  { %314 = vsyncpa [#allocation4], 1 }

</bundles_post_ra>
